<compile_context>
chip_gen: v7x
topology: tpu7x:2x2x1
jax: 0.10.0
libtpu: 0.0.40
codegen_flags: <defaults>
</compile_context>

<pallas_src>
import jax
import jax.numpy as jnp
from jax.experimental import pallas as pl
from jax.experimental.pallas import tpu as pltpu

BN_EPS = 1e-5


# ----------------------------- Pallas kernel ------------------------------- #

def _feedforward_kernel(x_ref, w1_ref, b1_ref, w2_ref, b2_ref, out_ref):
    """Fused: Linear1+BN1(folded) -> ReLU -> Linear2+BN2(folded) -> ReLU.

    x / W1 / W2 arrive in bf16 (MXU-native); accumulation, bias epilogue and the
    output are f32. Dropout layers are identity (eval mode).
    """
    x = x_ref[...]                                                     # bf16 [TM, d_model]
    h = jnp.dot(x, w1_ref[...], preferred_element_type=jnp.float32)   # f32 [TM, d_ff]
    h = jnp.maximum(h + b1_ref[...], 0.0)                             # bias + ReLU in f32
    h = h.astype(jnp.bfloat16)                                        # back to MXU dtype
    y = jnp.dot(h, w2_ref[...], preferred_element_type=jnp.float32)   # f32 [TM, d_model]
    out_ref[...] = jnp.maximum(y + b2_ref[...], 0.0)                  # bias + ReLU, f32 out


# ------------------------------ JAX wrapper -------------------------------- #

def _pick_tm(n):
    """Largest row tile in {1024 .. 8} that still gives >= 2 grid steps.

    Keeps both v7x TensorCores fed (parallel grid axis) while preferring large
    tiles (better HBM-roofline fraction, less per-step overhead) at large N.
    """
    for tm in (1024, 512, 256, 128, 64, 32, 16, 8):
        if pl.cdiv(n, tm) >= 2:
            return tm
    return 8


def feedforward(x, folded):
    """x: [N, d_model] f32. folded: BN-folded params (w1,w2 in bf16; b1,b2 f32)."""
    n, d_model = x.shape
    d_ff = folded["w1"].shape[1]

    tm = _pick_tm(n)
    grid = (pl.cdiv(n, tm),)

    x_bf16 = x.astype(jnp.bfloat16)

    # Advisory cost estimate for XLA's scheduler around the custom call.
    flops = 4 * n * d_model * d_ff                      # 2 matmuls, 2*M*N*K each
    bytes_accessed = (
        n * d_model * 2                                 # streamed x (bf16)
        + n * d_model * 4                               # output (f32)
        + 2 * d_model * d_ff * 2                        # W1' + W2' (bf16)
        + (d_ff + d_model) * 4                          # biases (f32)
    )

    out = pl.pallas_call(
        _feedforward_kernel,
        out_shape=jax.ShapeDtypeStruct((n, d_model), jnp.float32),
        grid=grid,
        in_specs=[
            pl.BlockSpec((tm, d_model), lambda i: (i, 0)),     # x tile (streamed, bf16)
            pl.BlockSpec((d_model, d_ff), lambda i: (0, 0)),   # W1' (resident, bf16)
            pl.BlockSpec((1, d_ff), lambda i: (0, 0)),         # b1' (resident, f32)
            pl.BlockSpec((d_ff, d_model), lambda i: (0, 0)),   # W2' (resident, bf16)
            pl.BlockSpec((1, d_model), lambda i: (0, 0)),      # b2' (resident, f32)
        ],
        out_specs=pl.BlockSpec((tm, d_model), lambda i: (i, 0)),
        compiler_params=pltpu.CompilerParams(
            dimension_semantics=("parallel",),
            vmem_limit_bytes=32 * 1024 * 1024,
        ),
        cost_estimate=pl.CostEstimate(
            flops=flops, transcendentals=0, bytes_accessed=bytes_accessed),
    )(x_bf16, folded["w1"], folded["b1"], folded["w2"], folded["b2"])
    return out


@jax.jit
def feedforward_forward(x, folded):
    return feedforward(x, folded)


# --------------------------- parameter handling ----------------------------- #

def _init_layer(key, in_f, out_f):
    ks = jax.random.split(key, 6)
    return dict(
        w=0.1 * jax.random.normal(ks[0], (in_f, out_f), jnp.float32),   # [in, out]
        b=0.1 * jax.random.normal(ks[1], (1, out_f), jnp.float32),
        gamma=1.0 + 0.1 * jax.random.normal(ks[2], (1, out_f), jnp.float32),
        beta=0.1 * jax.random.normal(ks[3], (1, out_f), jnp.float32),
        mean=0.1 * jax.random.normal(ks[4], (1, out_f), jnp.float32),
        var=jax.random.uniform(ks[5], (1, out_f), jnp.float32, 0.5, 1.5),
    )


def init_params(key, d_model, d_ff):
    k1, k2 = jax.random.split(key)
    return dict(l1=_init_layer(k1, d_model, d_ff),
                l2=_init_layer(k2, d_ff, d_model))


def fold_bn(raw):
    """Fold BatchNorm1d (running stats, affine) into each Linear's W / b.

    Weights are cast to bf16 for the MXU; biases stay f32 for the epilogue.
    """
    def fold(p):
        s = p["gamma"] / jnp.sqrt(p["var"] + BN_EPS)            # [1, out]
        w = (p["w"] * s).astype(jnp.bfloat16)                   # scale columns
        b = ((p["b"] - p["mean"]) * s + p["beta"]).astype(jnp.float32)
        return w, b
    w1, b1 = fold(raw["l1"])
    w2, b2 = fold(raw["l2"])
    return dict(w1=w1, b1=b1, w2=w2, b2=b2)


# ---------------------------- pure-JAX references ---------------------------- #

def reference_forward_f32(x, raw):
    """Exact f32 semantics of the PyTorch module (eval mode)."""
    def layer(h, p):
        y = h @ p["w"] + p["b"]
        y = (y - p["mean"]) / jnp.sqrt(p["var"] + BN_EPS) * p["gamma"] + p["beta"]
        return jnp.maximum(y, 0.0)          # ReLU; dropout = identity in eval
    return layer(layer(x, raw["l1"]), raw["l2"])


def reference_forward_bf16(x, folded):
    """Mirrors the kernel's bf16-operand / f32-accumulate numerics in plain JAX."""
    h = jnp.dot(x.astype(jnp.bfloat16), folded["w1"],
                preferred_element_type=jnp.float32) + folded["b1"]
    h = jnp.maximum(h, 0.0).astype(jnp.bfloat16)
    y = jnp.dot(h, folded["w2"],
                preferred_element_type=jnp.float32) + folded["b2"]
    return jnp.maximum(y, 0.0)


# ----------------------------------- main ------------------------------------ #

if __name__ == "__main__":
    # N is not a TM multiple -> exercises the masked partial last block.
    N, D_MODEL, D_FF = 300, 128, 256

    key = jax.random.PRNGKey(0)
    k_x, k_p = jax.random.split(key)

    x = jax.random.normal(k_x, (N, D_MODEL), jnp.float32)
    raw = init_params(k_p, D_MODEL, D_FF)
    folded = fold_bn(raw)

    out = feedforward_forward(x, folded)
    jax.block_until_ready(out)

    assert out.shape == (N, D_MODEL), out.shape

    # Tight check vs. a plain-JAX path with the same bf16/f32 numerics.
    ref_bf16 = reference_forward_bf16(x, folded)
    assert jnp.allclose(out, ref_bf16, atol=1e-2, rtol=1e-2), \
        "mismatch vs bf16-numerics JAX reference"

    # Loose check vs. the exact f32 module semantics (bf16 MXU path is approximate).
    ref_f32 = reference_forward_f32(x, raw)
    assert jnp.allclose(out, ref_f32, atol=1e-1, rtol=1e-1), \
        "mismatch vs f32 JAX reference"

    print("KERNEL_OK")
</pallas_src>

<mosaic_0001>
module attributes {stable_mosaic.version = 11 : i64} {
  func.func @_feedforward_kernel(%arg0: i32, %arg1: memref<256x128xbf16, #tpu.memory_space<vmem>>, %arg2: memref<128x256xbf16, #tpu.memory_space<vmem>>, %arg3: memref<1x256xf32, #tpu.memory_space<vmem>>, %arg4: memref<256x128xbf16, #tpu.memory_space<vmem>>, %arg5: memref<1x128xf32, #tpu.memory_space<vmem>>, %arg6: memref<256x128xf32, #tpu.memory_space<vmem>>) attributes {dimension_semantics = [#tpu.dimension_semantics<parallel>], iteration_bounds = array<i64: 2>, scalar_prefetch = 0 : i64, scratch_operands = 0 : i64, tpu.core_type = #tpu.core_type<tc>, window_params = [{transform_indices = @transform_0, window_bounds = array<i64: 256, 128>}, {pipeline_mode = #tpu.pipeline_mode<synchronous>, transform_indices = @transform_1, window_bounds = array<i64: 128, 256>}, {pipeline_mode = #tpu.pipeline_mode<synchronous>, transform_indices = @transform_2, window_bounds = array<i64: 1, 256>}, {pipeline_mode = #tpu.pipeline_mode<synchronous>, transform_indices = @transform_3, window_bounds = array<i64: 256, 128>}, {pipeline_mode = #tpu.pipeline_mode<synchronous>, transform_indices = @transform_4, window_bounds = array<i64: 1, 128>}, {transform_indices = @transform_5, window_bounds = array<i64: 256, 128>}]} {
    %c0 = arith.constant 0 : index
    %c0_0 = arith.constant 0 : index
    %0 = vector.load %arg1[%c0, %c0_0] : memref<256x128xbf16, #tpu.memory_space<vmem>>, vector<256x128xbf16>
    %c0_1 = arith.constant 0 : index
    %c0_2 = arith.constant 0 : index
    %1 = vector.load %arg2[%c0_1, %c0_2] : memref<128x256xbf16, #tpu.memory_space<vmem>>, vector<128x256xbf16>
    %cst = arith.constant dense<0.000000e+00> : vector<256x256xf32>
    %2 = tpu.matmul %0, %1, %cst {dimension_numbers = #tpu.dot_dimension_numbers<[1], [0], [0], [1], [0, 0, 1, 1], [], []>} : vector<256x128xbf16>, vector<128x256xbf16>, vector<256x256xf32> -> vector<256x256xf32>
    %c0_3 = arith.constant 0 : index
    %c0_4 = arith.constant 0 : index
    %3 = vector.load %arg3[%c0_3, %c0_4] : memref<1x256xf32, #tpu.memory_space<vmem>>, vector<1x256xf32>
    %4 = vector.broadcast %3 : vector<1x256xf32> to vector<256x256xf32>
    %5 = arith.addf %2, %4 : vector<256x256xf32>
    %cst_5 = arith.constant 0.000000e+00 : f32
    %6 = vector.broadcast %cst_5 : f32 to vector<256x256xf32>
    %7 = arith.maximumf %5, %6 : vector<256x256xf32>
    %8 = arith.truncf %7 : vector<256x256xf32> to vector<256x256xbf16>
    %c0_6 = arith.constant 0 : index
    %c0_7 = arith.constant 0 : index
    %9 = vector.load %arg4[%c0_6, %c0_7] : memref<256x128xbf16, #tpu.memory_space<vmem>>, vector<256x128xbf16>
    %cst_8 = arith.constant dense<0.000000e+00> : vector<256x128xf32>
    %10 = tpu.matmul %8, %9, %cst_8 {dimension_numbers = #tpu.dot_dimension_numbers<[1], [0], [0], [1], [0, 0, 1, 1], [], []>} : vector<256x256xbf16>, vector<256x128xbf16>, vector<256x128xf32> -> vector<256x128xf32>
    %c0_9 = arith.constant 0 : index
    %c0_10 = arith.constant 0 : index
    %11 = vector.load %arg5[%c0_9, %c0_10] : memref<1x128xf32, #tpu.memory_space<vmem>>, vector<1x128xf32>
    %12 = vector.broadcast %11 : vector<1x128xf32> to vector<256x128xf32>
    %13 = arith.addf %10, %12 : vector<256x128xf32>
    %cst_11 = arith.constant 0.000000e+00 : f32
    %14 = vector.broadcast %cst_11 : f32 to vector<256x128xf32>
    %15 = arith.maximumf %13, %14 : vector<256x128xf32>
    %c0_12 = arith.constant 0 : index
    %c0_13 = arith.constant 0 : index
    %16 = vector.load %arg6[%c0_12, %c0_13] : memref<256x128xf32, #tpu.memory_space<vmem>>, vector<256x128xf32>
    tpu.vector_store %arg6[%c0_12, %c0_13], %15 {strides = array<i32>} : memref<256x128xf32, #tpu.memory_space<vmem>>, vector<256x128xf32>,
    return
  }
  func.func @transform_0(%arg0: i32) -> (i32, i32) {
    %c0_i32 = arith.constant 0 : i32
    %c0_i32_0 = arith.constant 0 : i32
    return %arg0, %c0_i32 : i32, i32
  }
  func.func @transform_1(%arg0: i32) -> (i32, i32) {
    %c0_i32 = arith.constant 0 : i32
    %c0_i32_0 = arith.constant 0 : i32
    %c0_i32_1 = arith.constant 0 : i32
    return %c0_i32, %c0_i32_0 : i32, i32
  }
  func.func @transform_2(%arg0: i32) -> (i32, i32) {
    %c0_i32 = arith.constant 0 : i32
    %c0_i32_0 = arith.constant 0 : i32
    %c0_i32_1 = arith.constant 0 : i32
    return %c0_i32, %c0_i32_0 : i32, i32
  }
  func.func @transform_3(%arg0: i32) -> (i32, i32) {
    %c0_i32 = arith.constant 0 : i32
    %c0_i32_0 = arith.constant 0 : i32
    %c0_i32_1 = arith.constant 0 : i32
    return %c0_i32, %c0_i32_0 : i32, i32
  }
  func.func @transform_4(%arg0: i32) -> (i32, i32) {
    %c0_i32 = arith.constant 0 : i32
    %c0_i32_0 = arith.constant 0 : i32
    %c0_i32_1 = arith.constant 0 : i32
    return %c0_i32, %c0_i32_0 : i32, i32
  }
  func.func @transform_5(%arg0: i32) -> (i32, i32) {
    %c0_i32 = arith.constant 0 : i32
    %c0_i32_0 = arith.constant 0 : i32
    return %arg0, %c0_i32 : i32, i32
  }
}

</mosaic_0001>

<bundles_post_ra>
// kernel: feedforward_forward.1
= control target key start
LH: loop header
LB: loop body
LE: loop exit
PB: predicated region body
PF: predicated region fallthrough
CT: control target
= control target key end

     0   :  { %10 = vsyncpa [#allocation3], 0  ;;  %s1985_s0 = inlined_call_operand.vmem [shape: bf16[300,128], index: 0, kind: input, shape index: {}]   ;;  %s1986_s1 = inlined_call_operand.vmem [shape: bf16[128,256], index: 1, kind: input, shape index: {}]   ;;  %s1987_s2 = inlined_call_operand.vmem [shape: f32[1,256], index: 2, kind: input, shape index: {}]   ;;  %s1988_s3 = inlined_call_operand.vmem [shape: bf16[256,128], index: 3, kind: input, shape index: {}]   ;;  %s1989_s4 = inlined_call_operand.vmem [shape: f32[1,128], index: 4, kind: input, shape index: {}]   ;;  %s1990_s5 = inlined_call_operand.hbm [shape: f32[300,128], index: 5, kind: output, shape index: {}]  }
   0x1   :  { %12 = vsyncpa [#allocation3 + $0x1], 0  ;;  %s1591_s18 = smov 0   ;;  %s1593_s19 = smov 0  }
   0x2   :  { %s1595_s20 = smov 0   ;;  %s1597_s21 = smov 0  }
   0x3 LB: > { %s1612_s22 = sadd.s32 4294967295, %s1555_s21   ;;  %s1218_s23 = sadd.s32 4294967294, %s1555_s21   ;;  %s1555_s21 = sphi %s1597_s21, %s1996_s21   ;;  %s1551_s20 = sphi %s1595_s20, %s1995_s20   ;;  %s1547_s19 = sphi %s1593_s19, %s1994_s19   ;;  %s1543_s18 = sphi %s1591_s18, %s1993_s18  }
   0x4   : > { %s1616_s24 = sadd.s32 1, %s1555_s21   ;;  %s135_s25 = sadd.s32 1, %s1551_s20 }
   0x5   : > { %s132_s26 = ssub.s32 %s1555_s21, %s1616_s24  ;;  %p145_p0 = scmp.ne.s32.totalorder %s1551_s20, %s1547_s19 }
   0x6   : > { %p133_p1 = scmp.eq.s32.totalorder %s132_s26, 0  ;;  %p146_p2 = scmp.eq.s32.totalorder %s1612_s22, 1 }
   0x7   : > { %p151_p3 = scmp.ne.s32.totalorder %s1547_s19, %s1543_s18  ;;  %p152_p4 = scmp.eq.s32.totalorder %s1218_s23, 1 }
   0x8   : > { %s1627_s27 = scalar_select %p133_p1, %s1551_s20, %s135_s25  }
   0x9   : > { %p1629_p5 = por %p146_p2, %p145_p0  ;;  %p1633_p6 = por %p152_p4, %p151_p3 }
   0xa   : > { %p1221_p7 = scmp.ge.s32.totalorder %s1555_s21, 1  ;;  %p199_p8 = scmp.lt.s32.totalorder %s1555_s21, 3 }
   0xc   : > { %p200_p9 = pnand %p1221_p7, %p199_p8 }
   0xd   : > { %v1437_v0 = vld [vmem:[%s1986_s1 + $0x4] ss:$8 sps:$4 sm:$0xff] (!%p200_p9)   ;;  %s1643_s7 = sshll.u32 (!%p200_p9), %s1612_s22, 5  ;;  %v1439_v1 = vld [vmem:[%s1986_s1] ss:$8 sps:$4 sm:$0xff] (!%p200_p9)   ;;  %v1557_v2 = vmov (!%p200_p9), 0   ;;  %v301_v49 = vlaneseq (!%p200_p9) }
   0xe   : > { %203 = sbr.rel (%p200_p9) target bundleno = 638 (0x27e), region = 40  ;;  %519 = vmatprep.mubr.bf16.mxu0 (!%p200_p9), %v1557_v2  ;;  %p236_p10 = scmp.lt.s32.totalorder (!%p200_p9), %s1643_s7, 37  ;;  %487 = vmatprep.subr.bf16.mxu0 (!%p200_p9), %v1437_v0  ;;  %v1440_v3 = vld [vmem:[%s1986_s1 + $0x14] ss:$8 sps:$4 sm:$0xff] (!%p200_p9)   ;;  %v1442_v4 = vld [vmem:[%s1986_s1 + $0x10] ss:$8 sps:$4 sm:$0xff] (!%p200_p9)  }
   0xf   : > { %488 = vmatpush1.bf16.msra.mxu0 (!%p200_p9), %v1439_v1  ;;  %v1443_v5 = vld [vmem:[%s1986_s1 + $0x24] ss:$8 sps:$4 sm:$0xff] (!%p200_p9)   ;;  %v1445_v6 = vld [vmem:[%s1986_s1 + $0x20] ss:$8 sps:$4 sm:$0xff] (!%p200_p9)   ;;  %v1446_v7 = vld [vmem:[%s1986_s1 + $0x34] ss:$8 sps:$4 sm:$0xff] (!%p200_p9)  }
  0x10   : > { %489 = vmatprep.subr.bf16.mxu0 (!%p200_p9), %v1440_v3  ;;  %v1448_v8 = vld [vmem:[%s1986_s1 + $0x30] ss:$8 sps:$4 sm:$0xff] (!%p200_p9)   ;;  %v1449_v9 = vld [vmem:[%s1986_s1 + $0x44] ss:$8 sps:$4 sm:$0xff] (!%p200_p9)   ;;  %v1451_v10 = vld [vmem:[%s1986_s1 + $0x40] ss:$8 sps:$4 sm:$0xff] (!%p200_p9)  }
  0x11   : > { %v1452_v11 = vld [vmem:[%s1986_s1 + $0x54] ss:$8 sps:$4 sm:$0xff] (!%p200_p9)   ;;  %v1454_v12 = vld [vmem:[%s1986_s1 + $0x50] ss:$8 sps:$4 sm:$0xff] (!%p200_p9)   ;;  %v1455_v13 = vld [vmem:[%s1986_s1 + $0x64] ss:$8 sps:$4 sm:$0xff] (!%p200_p9)  }
  0x12   : > { %v1457_v14 = vld [vmem:[%s1986_s1 + $0x60] ss:$8 sps:$4 sm:$0xff] (!%p200_p9)   ;;  %v1458_v15 = vld [vmem:[%s1986_s1 + $0x74] ss:$8 sps:$4 sm:$0xff] (!%p200_p9)   ;;  %v1460_v16 = vld [vmem:[%s1986_s1 + $0x70] ss:$8 sps:$4 sm:$0xff] (!%p200_p9)  }
  0x13   : > { %490 = vmatpush1.bf16.msra.mxu0 (!%p200_p9), %v1442_v4  ;;  %v1477_v17 = vld [vmem:[%s1988_s3 + $0x40] sm:$0xff] (!%p200_p9)   ;;  %v1479_v20 = vld [vmem:[%s1988_s3 + $0x48] sm:$0xff] (!%p200_p9)   ;;  %v1481_v22 = vld [vmem:[%s1988_s3 + $0x50] sm:$0xff] (!%p200_p9)   ;;  %v302_v50 = vshrl.u32 (!%p200_p9), %v301_v49, 7 }
  0x14   : > { %491 = vmatprep.subr.bf16.mxu0 (!%p200_p9), %v1443_v5  ;;  %v1478_v19 = vld [vmem:[%s1988_s3] sm:$0xff] (!%p200_p9)   ;;  %1284 = vmatprep.subr.bf16.mxu1 (!%p200_p9), %v1477_v17  ;;  %v1480_v21 = vld [vmem:[%s1988_s3 + $0x8] sm:$0xff] (!%p200_p9)   ;;  %v1482_v23 = vld [vmem:[%s1988_s3 + $0x10] sm:$0xff] (!%p200_p9)  }
  0x15   : > { %s237_s14 = scalar_select %p236_p10, %s1643_s7, 37  ;;  %1285 = vmatpush3.bf16.msra.mxu1 %v1478_v19  ;;  %v1483_v24 = vld [vmem:[%s1988_s3 + $0x58] sm:$0xff]   ;;  %v1485_v27 = vld [vmem:[%s1988_s3 + $0x60] sm:$0xff]   ;;  %v1487_v29 = vld [vmem:[%s1988_s3 + $0x68] sm:$0xff]   ;;  %v303_v51 = vsub.s32 0, %v302_v50  ;;  %v307_v53 = vsub.s32 1, %v302_v50 }
  0x16   : > { %1286 = vmatprep.subr.bf16.mxu1 %v1479_v20  ;;  %v1484_v26 = vld [vmem:[%s1988_s3 + $0x18] sm:$0xff]   ;;  %v1486_v28 = vld [vmem:[%s1988_s3 + $0x20] sm:$0xff]   ;;  %v1488_v39 = vld [vmem:[%s1988_s3 + $0x28] sm:$0xff]   ;;  %s1145_s11 = ssub.s32 (%p1629_p5), 38, %s1643_s7 }
  0x17   : > { %s1224_s17 = sshll.u32 %s237_s14, 2  ;;  %492 = vmatpush1.bf16.msra.mxu0 %v1445_v6  ;;  %v1489_v41 = vld [vmem:[%s1988_s3 + $0x70] sm:$0xff]   ;;  %v1491_v43 = vld [vmem:[%s1988_s3 + $0x78] sm:$0xff]   ;;  %v299_v52 = vld [vmem:[%s1987_s2] sm:$0x3]  ;;  %p1146_p11 = scmp.lt.s32.totalorder (%p1629_p5), %s1145_s11, 32 }
  0x18   : > { %s1669_s9 = scalar_lea.vmem %s1985_s0, %s1224_s17  ;;  %493 = vmatprep.subr.bf16.mxu0 %v1446_v7  ;;  %v1490_v42 = vld [vmem:[%s1988_s3 + $0x30] sm:$0xff]   ;;  %v1492_v44 = vld [vmem:[%s1988_s3 + $0x38] sm:$0xff]   ;;  %v1780_v54 = vrot.slane %v299_v52, %v303_v51  ;;  %v1782_v55 = vrot.slane %v299_v52, %v307_v53 }
  0x19   : > { %v1461_v18 = vld [vmem:[%s1669_s9] sm:$0xff]   ;;  %1287 = vmatpush3.bf16.msra.mxu1 %v1480_v21  ;;  %v1462_v25 = vld [vmem:[%s1669_s9 + $0x8] sm:$0xff]   ;;  %v1463_v30 = vld [vmem:[%s1669_s9 + $0x10] sm:$0xff]  }
  0x1a   : > { %1288 = vmatprep.subr.bf16.mxu1 %v1481_v22  ;;  %v1464_v31 = vld [vmem:[%s1669_s9 + $0x18] sm:$0xff]   ;;  %v1465_v32 = vld [vmem:[%s1669_s9 + $0x20] sm:$0xff]   ;;  %v1466_v33 = vld [vmem:[%s1669_s9 + $0x28] sm:$0xff]  }
  0x1b   : > { %494 = vmatpush1.bf16.msra.mxu0 %v1448_v8  ;;  %v1467_v34 = vld [vmem:[%s1669_s9 + $0x30] sm:$0xff]   ;;  %v1468_v35 = vld [vmem:[%s1669_s9 + $0x38] sm:$0xff]   ;;  %v1469_v36 = vld [vmem:[%s1669_s9 + $0x40] sm:$0xff]  }
  0x1c   : > { %495 = vmatprep.subr.bf16.mxu0 %v1449_v9  ;;  %v1470_v37 = vld [vmem:[%s1669_s9 + $0x48] sm:$0xff]   ;;  %v1471_v38 = vld [vmem:[%s1669_s9 + $0x50] sm:$0xff]   ;;  %v1472_v40 = vld [vmem:[%s1669_s9 + $0x58] sm:$0xff]  }
  0x1d   : > { %1289 = vmatpush3.bf16.msra.mxu1 %v1482_v23  ;;  %v1473_v45 = vld [vmem:[%s1669_s9 + $0x60] sm:$0xff]   ;;  %v1474_v46 = vld [vmem:[%s1669_s9 + $0x68] sm:$0xff]   ;;  %v1475_v47 = vld [vmem:[%s1669_s9 + $0x70] sm:$0xff]  }
  0x1e   : > { %1290 = vmatprep.subr.bf16.mxu1 %v1483_v24  ;;  %v1476_v48 = vld [vmem:[%s1669_s9 + $0x78] sm:$0xff]   ;;  %s228_s9 = sand.u32 1, %s1547_s19  }
  0x1f   : > { %496 = vmatpush1.bf16.msra.mxu0 %v1451_v10  ;;  %s1222_s6 = sshll.u32 %s228_s9, 8  ;;  %s1924_s10 = scalar_lea.sflag [#allocation3], %s228_s9 }
  0x20   : > { %497 = vmatprep.subr.bf16.mxu0 %v1452_v11  ;;  %s1858_s8 = scalar_lea.vmem [#allocation2], %s1222_s6 }
  0x21   : > { %1291 = vmatpush3.bf16.msra.mxu1 %v1484_v26 }
  0x22   : > { %1292 = vmatprep.subr.bf16.mxu1 %v1485_v27 }
  0x23   : > { %498 = vmatpush1.bf16.msra.mxu0 %v1454_v12 }
  0x24   : > { %499 = vmatprep.subr.bf16.mxu0 %v1455_v13 }
  0x25   : > { %1293 = vmatpush3.bf16.msra.mxu1 %v1486_v28 }
  0x26   : > { %1294 = vmatprep.subr.bf16.mxu1 %v1487_v29 }
  0x27   : > { %500 = vmatpush1.bf16.msra.mxu0 %v1457_v14 }
  0x28   : > { %501 = vmatprep.subr.bf16.mxu0 %v1458_v15 }
  0x29   : > { %1295 = vmatpush3.bf16.msra.mxu1 %v1488_v39 }
  0x2a   : > { %1296 = vmatprep.subr.bf16.mxu1 %v1489_v41 }
  0x2b   : > { %502 = vmatpush1.bf16.msra.mxu0 %v1460_v16 }
  0x2d   : > { %1297 = vmatpush3.bf16.msra.mxu1 %v1490_v42 }
  0x2e   : > { %520 = vmatmul.mubr.bf16.vlgmr.msra.gmra.mrb[0].mxu0 %v1461_v18  ;;  %1298 = vmatprep.subr.bf16.mxu1 %v1491_v43 }
  0x2f   : > { %529 = vmatprep.mubr.bf16.mxu0 %v1557_v2 }
  0x31   : > { %1299 = vmatpush3.bf16.msra.mxu1 %v1492_v44 }
  0x36   : > { %530 = vmatmul.mubr.bf16.gmra.mrb[4].mxu0 %v1462_v25 }
  0x37   : > { %539 = vmatprep.mubr.bf16.mxu0 %v1557_v2 }
  0x3e   : > { %540 = vmatmul.mubr.bf16.gmra.mrb[8].mxu0 %v1463_v30 }
  0x3f   : > { %549 = vmatprep.mubr.bf16.mxu0 %v1557_v2 }
  0x46   : > { %550 = vmatmul.mubr.bf16.gmra.mrb[12].mxu0 %v1464_v31 }
  0x47   : > { %559 = vmatprep.mubr.bf16.mxu0 %v1557_v2 }
  0x4e   : > { %560 = vmatmul.mubr.bf16.gmra.mrb[16].mxu0 %v1465_v32 }
  0x4f   : > { %569 = vmatprep.mubr.bf16.mxu0 %v1557_v2 }
  0x56   : > { %570 = vmatmul.mubr.bf16.gmra.mrb[20].mxu0 %v1466_v33 }
  0x57   : > { %579 = vmatprep.mubr.bf16.mxu0 %v1557_v2 }
  0x5e   : > { %580 = vmatmul.mubr.bf16.gmra.mrb[24].mxu0 %v1467_v34 }
  0x5f   : > { %589 = vmatprep.mubr.bf16.mxu0 %v1557_v2 }
  0x66   : > { %590 = vmatmul.mubr.bf16.gmra.mrb[28].mxu0 %v1468_v35 }
  0x67   : > { %599 = vmatprep.mubr.bf16.mxu0 %v1557_v2 }
  0x6e   : > { %600 = vmatmul.mubr.bf16.gmra.mrb[32].mxu0 %v1469_v36 }
  0x6f   : > { %609 = vmatprep.mubr.bf16.mxu0 %v1557_v2 }
  0x76   : > { %610 = vmatmul.mubr.bf16.gmra.mrb[36].mxu0 %v1470_v37 }
  0x77   : > { %619 = vmatprep.mubr.bf16.mxu0 %v1557_v2 }
  0x7e   : > { %620 = vmatmul.mubr.bf16.gmra.mrb[40].mxu0 %v1471_v38 }
  0x7f   : > { %629 = vmatprep.mubr.bf16.mxu0 %v1557_v2 }
  0x86   : > { %630 = vmatmul.mubr.bf16.gmra.mrb[44].mxu0 %v1472_v40 }
  0x87   : > { %639 = vmatprep.mubr.bf16.mxu0 %v1557_v2 }
  0x8e   : > { %640 = vmatmul.mubr.bf16.gmra.mrb[48].mxu0 %v1473_v45 }
  0x8f   : > { %649 = vmatprep.mubr.bf16.mxu0 %v1557_v2 }
  0x96   : > { %650 = vmatmul.mubr.bf16.gmra.mrb[52].mxu0 %v1474_v46 }
  0x97   : > { %659 = vmatprep.mubr.bf16.mxu0 %v1557_v2 }
  0x9e   : > { %660 = vmatmul.mubr.bf16.gmra.mrb[56].mxu0 %v1475_v47 }
  0x9f   : > { %669 = vmatprep.mubr.bf16.mxu0 %v1557_v2 }
  0xa6   : > { %670 = vmatmul.mubr.bf16.gmra.mrb[60].mxu0 %v1476_v48 }
 0x101   : > { %v521_v56 = vpop.f32.mrb[0].mxu0 }
 0x102   : > { %v522_v57 = vadd.f32 %v521_v56, %v1780_v54  ;;  %v523_v58 = vpop.f32.mrb[1].mxu0 }
 0x103   : > { %v524_v59 = vadd.f32 %v523_v58, %v1782_v55  ;;  %v525_v60 = vpop.f32.mrb[2].mxu0 }
 0x104   : > { %v526_v61 = vadd.f32 %v525_v60, %v1780_v54  ;;  %v527_v62 = vpop.f32.mrb[3].mxu0  ;;  %v680_v0 = vmax.f32 %v522_v57, 0.0 }
 0x105   : > { %v528_v63 = vadd.f32 %v527_v62, %v1782_v55  ;;  %v681_v2 = vmax.f32 %v524_v59, 0.0 }
 0x106   : > { %v682_v1 = vmax.f32 %v526_v61, 0.0 }
 0x107   : > { %v683_v3 = vmax.f32 %v528_v63, 0.0 }
 0x108   : > { %v744_v4 = vpack.c.bf16 %v682_v1, %v680_v0 }
 0x109   : > { %v531_v5 = vpop.f32.mrb[4].mxu0  ;;  %v745_v6 = vpack.c.bf16 %v683_v3, %v681_v2 }
 0x10a   : > { %v532_v7 = vadd.f32 %v531_v5, %v1780_v54  ;;  %v533_v8 = vpop.f32.mrb[5].mxu0 }
 0x10b   : > { %v534_v9 = vadd.f32 %v533_v8, %v1782_v55  ;;  %v535_v10 = vpop.f32.mrb[6].mxu0  ;;  %943 = vmatprep.mubr.bf16.mxu1 %v745_v6 }
 0x10c   : > { %v536_v11 = vadd.f32 %v535_v10, %v1780_v54  ;;  %v537_v12 = vpop.f32.mrb[7].mxu0  ;;  %944 = vmatmul.mubr.bf16.vlgmr.msra.gmra.mrb[0].mxu1 %v744_v4  ;;  %v684_v14 = vmax.f32 %v532_v7, 0.0 }
 0x10d   : > { %v538_v13 = vadd.f32 %v537_v12, %v1782_v55  ;;  %v685_v16 = vmax.f32 %v534_v9, 0.0 }
 0x10e   : > { %v686_v15 = vmax.f32 %v536_v11, 0.0 }
 0x10f   : > { %v687_v17 = vmax.f32 %v538_v13, 0.0 }
 0x110   : > { %v746_v18 = vpack.c.bf16 %v686_v15, %v684_v14 }
 0x111   : > { %v747_v19 = vpack.c.bf16 %v687_v17, %v685_v16  ;;  %v541_v20 = vpop.f32.mrb[8].mxu0 }
 0x112   : > { %v542_v21 = vadd.f32 %v541_v20, %v1780_v54  ;;  %v543_v22 = vpop.f32.mrb[9].mxu0 }
 0x113   : > { %v544_v23 = vadd.f32 %v543_v22, %v1782_v55  ;;  %v545_v24 = vpop.f32.mrb[10].mxu0  ;;  %951 = vmatprep.mubr.bf16.mxu1 %v747_v19 }
 0x114   : > { %v546_v25 = vadd.f32 %v545_v24, %v1780_v54  ;;  %v547_v26 = vpop.f32.mrb[11].mxu0  ;;  %952 = vmatmul.mubr.bf16.gmra.mrb[4].mxu1 %v746_v18  ;;  %v688_v28 = vmax.f32 %v542_v21, 0.0 }
 0x115   : > { %v548_v27 = vadd.f32 %v547_v26, %v1782_v55  ;;  %v689_v30 = vmax.f32 %v544_v23, 0.0 }
 0x116   : > { %v690_v29 = vmax.f32 %v546_v25, 0.0 }
 0x117   : > { %v691_v31 = vmax.f32 %v548_v27, 0.0 }
 0x118   : > { %v748_v32 = vpack.c.bf16 %v690_v29, %v688_v28 }
 0x119   : > { %v749_v33 = vpack.c.bf16 %v691_v31, %v689_v30  ;;  %v551_v34 = vpop.f32.mrb[12].mxu0 }
 0x11a   : > { %v552_v35 = vadd.f32 %v551_v34, %v1780_v54  ;;  %v553_v36 = vpop.f32.mrb[13].mxu0 }
 0x11b   : > { %v554_v37 = vadd.f32 %v553_v36, %v1782_v55  ;;  %v555_v38 = vpop.f32.mrb[14].mxu0  ;;  %959 = vmatprep.mubr.bf16.mxu1 %v749_v33 }
 0x11c   : > { %v556_v39 = vadd.f32 %v555_v38, %v1780_v54  ;;  %v557_v40 = vpop.f32.mrb[15].mxu0  ;;  %960 = vmatmul.mubr.bf16.gmra.mrb[8].mxu1 %v748_v32  ;;  %v692_v42 = vmax.f32 %v552_v35, 0.0 }
 0x11d   : > { %v558_v41 = vadd.f32 %v557_v40, %v1782_v55  ;;  %v693_v44 = vmax.f32 %v554_v37, 0.0 }
 0x11e   : > { %v694_v43 = vmax.f32 %v556_v39, 0.0 }
 0x11f   : > { %v695_v45 = vmax.f32 %v558_v41, 0.0 }
 0x120   : > { %v750_v46 = vpack.c.bf16 %v694_v43, %v692_v42 }
 0x121   : > { %v751_v47 = vpack.c.bf16 %v695_v45, %v693_v44  ;;  %v561_v48 = vpop.f32.mrb[16].mxu0 }
 0x122   : > { %v562_v49 = vadd.f32 %v561_v48, %v1780_v54  ;;  %v563_v50 = vpop.f32.mrb[17].mxu0 }
 0x123   : > { %v564_v51 = vadd.f32 %v563_v50, %v1782_v55  ;;  %v565_v52 = vpop.f32.mrb[18].mxu0  ;;  %967 = vmatprep.mubr.bf16.mxu1 %v751_v47 }
 0x124   : > { %v566_v53 = vadd.f32 %v565_v52, %v1780_v54  ;;  %v567_v56 = vpop.f32.mrb[19].mxu0  ;;  %968 = vmatmul.mubr.bf16.gmra.mrb[12].mxu1 %v750_v46  ;;  %v696_v58 = vmax.f32 %v562_v49, 0.0 }
 0x125   : > { %v568_v57 = vadd.f32 %v567_v56, %v1782_v55  ;;  %v697_v60 = vmax.f32 %v564_v51, 0.0 }
 0x126   : > { %v698_v59 = vmax.f32 %v566_v53, 0.0 }
 0x127   : > { %v699_v61 = vmax.f32 %v568_v57, 0.0 }
 0x128   : > { %v752_v62 = vpack.c.bf16 %v698_v59, %v696_v58 }
 0x129   : > { %v753_v63 = vpack.c.bf16 %v699_v61, %v697_v60  ;;  %v571_v0 = vpop.f32.mrb[20].mxu0 }
 0x12a   : > { %v572_v1 = vadd.f32 %v571_v0, %v1780_v54  ;;  %v573_v2 = vpop.f32.mrb[21].mxu0 }
 0x12b   : > { %v574_v3 = vadd.f32 %v573_v2, %v1782_v55  ;;  %v575_v4 = vpop.f32.mrb[22].mxu0  ;;  %975 = vmatprep.mubr.bf16.mxu1 %v753_v63 }
 0x12c   : > { %v576_v5 = vadd.f32 %v575_v4, %v1780_v54  ;;  %v577_v6 = vpop.f32.mrb[23].mxu0  ;;  %976 = vmatmul.mubr.bf16.gmra.mrb[16].mxu1 %v752_v62  ;;  %v700_v8 = vmax.f32 %v572_v1, 0.0 }
 0x12d   : > { %v578_v7 = vadd.f32 %v577_v6, %v1782_v55  ;;  %v701_v10 = vmax.f32 %v574_v3, 0.0 }
 0x12e   : > { %v702_v9 = vmax.f32 %v576_v5, 0.0 }
 0x12f   : > { %v703_v11 = vmax.f32 %v578_v7, 0.0 }
 0x130   : > { %v754_v12 = vpack.c.bf16 %v702_v9, %v700_v8 }
 0x131   : > { %v755_v13 = vpack.c.bf16 %v703_v11, %v701_v10  ;;  %v581_v14 = vpop.f32.mrb[24].mxu0 }
 0x132   : > { %v582_v15 = vadd.f32 %v581_v14, %v1780_v54  ;;  %v583_v16 = vpop.f32.mrb[25].mxu0 }
 0x133   : > { %v584_v17 = vadd.f32 %v583_v16, %v1782_v55  ;;  %v585_v18 = vpop.f32.mrb[26].mxu0  ;;  %983 = vmatprep.mubr.bf16.mxu1 %v755_v13 }
 0x134   : > { %v586_v19 = vadd.f32 %v585_v18, %v1780_v54  ;;  %v587_v20 = vpop.f32.mrb[27].mxu0  ;;  %984 = vmatmul.mubr.bf16.gmra.mrb[20].mxu1 %v754_v12  ;;  %v704_v22 = vmax.f32 %v582_v15, 0.0 }
 0x135   : > { %v588_v21 = vadd.f32 %v587_v20, %v1782_v55  ;;  %v705_v24 = vmax.f32 %v584_v17, 0.0 }
 0x136   : > { %v706_v23 = vmax.f32 %v586_v19, 0.0 }
 0x137   : > { %v707_v25 = vmax.f32 %v588_v21, 0.0 }
 0x138   : > { %v756_v26 = vpack.c.bf16 %v706_v23, %v704_v22 }
 0x139   : > { %v757_v27 = vpack.c.bf16 %v707_v25, %v705_v24  ;;  %v591_v28 = vpop.f32.mrb[28].mxu0 }
 0x13a   : > { %v592_v29 = vadd.f32 %v591_v28, %v1780_v54  ;;  %v593_v30 = vpop.f32.mrb[29].mxu0 }
 0x13b   : > { %v594_v31 = vadd.f32 %v593_v30, %v1782_v55  ;;  %v595_v32 = vpop.f32.mrb[30].mxu0  ;;  %991 = vmatprep.mubr.bf16.mxu1 %v757_v27 }
 0x13c   : > { %v596_v33 = vadd.f32 %v595_v32, %v1780_v54  ;;  %v597_v34 = vpop.f32.mrb[31].mxu0  ;;  %992 = vmatmul.mubr.bf16.gmra.mrb[24].mxu1 %v756_v26  ;;  %v708_v36 = vmax.f32 %v592_v29, 0.0 }
 0x13d   : > { %v598_v35 = vadd.f32 %v597_v34, %v1782_v55  ;;  %v709_v38 = vmax.f32 %v594_v31, 0.0 }
 0x13e   : > { %v710_v37 = vmax.f32 %v596_v33, 0.0 }
 0x13f   : > { %v711_v39 = vmax.f32 %v598_v35, 0.0 }
 0x140   : > { %v758_v40 = vpack.c.bf16 %v710_v37, %v708_v36 }
 0x141   : > { %v759_v41 = vpack.c.bf16 %v711_v39, %v709_v38  ;;  %v601_v42 = vpop.f32.mrb[32].mxu0 }
 0x142   : > { %v602_v43 = vadd.f32 %v601_v42, %v1780_v54  ;;  %v603_v44 = vpop.f32.mrb[33].mxu0 }
 0x143   : > { %v604_v45 = vadd.f32 %v603_v44, %v1782_v55  ;;  %v605_v46 = vpop.f32.mrb[34].mxu0  ;;  %999 = vmatprep.mubr.bf16.mxu1 %v759_v41 }
 0x144   : > { %v606_v47 = vadd.f32 %v605_v46, %v1780_v54  ;;  %v607_v48 = vpop.f32.mrb[35].mxu0  ;;  %1000 = vmatmul.mubr.bf16.gmra.mrb[28].mxu1 %v758_v40  ;;  %v712_v50 = vmax.f32 %v602_v43, 0.0 }
 0x145   : > { %v608_v49 = vadd.f32 %v607_v48, %v1782_v55  ;;  %v713_v52 = vmax.f32 %v604_v45, 0.0 }
 0x146   : > { %v714_v51 = vmax.f32 %v606_v47, 0.0 }
 0x147   : > { %v715_v53 = vmax.f32 %v608_v49, 0.0 }
 0x148   : > { %v760_v56 = vpack.c.bf16 %v714_v51, %v712_v50 }
 0x149   : > { %v761_v57 = vpack.c.bf16 %v715_v53, %v713_v52  ;;  %v611_v58 = vpop.f32.mrb[36].mxu0 }
 0x14a   : > { %v612_v59 = vadd.f32 %v611_v58, %v1780_v54  ;;  %v613_v60 = vpop.f32.mrb[37].mxu0 }
 0x14b   : > { %v614_v61 = vadd.f32 %v613_v60, %v1782_v55  ;;  %v615_v62 = vpop.f32.mrb[38].mxu0  ;;  %1007 = vmatprep.mubr.bf16.mxu1 %v761_v57 }
 0x14c   : > { %v616_v63 = vadd.f32 %v615_v62, %v1780_v54  ;;  %v617_v0 = vpop.f32.mrb[39].mxu0  ;;  %1008 = vmatmul.mubr.bf16.gmra.mrb[32].mxu1 %v760_v56  ;;  %v716_v2 = vmax.f32 %v612_v59, 0.0 }
 0x14d   : > { %v618_v1 = vadd.f32 %v617_v0, %v1782_v55  ;;  %v717_v4 = vmax.f32 %v614_v61, 0.0 }
 0x14e   : > { %v718_v3 = vmax.f32 %v616_v63, 0.0 }
 0x14f   : > { %v719_v5 = vmax.f32 %v618_v1, 0.0 }
 0x150   : > { %v762_v6 = vpack.c.bf16 %v718_v3, %v716_v2 }
 0x151   : > { %v763_v7 = vpack.c.bf16 %v719_v5, %v717_v4  ;;  %v621_v8 = vpop.f32.mrb[40].mxu0 }
 0x152   : > { %v622_v9 = vadd.f32 %v621_v8, %v1780_v54  ;;  %v623_v10 = vpop.f32.mrb[41].mxu0 }
 0x153   : > { %v624_v11 = vadd.f32 %v623_v10, %v1782_v55  ;;  %v625_v12 = vpop.f32.mrb[42].mxu0  ;;  %1015 = vmatprep.mubr.bf16.mxu1 %v763_v7 }
 0x154   : > { %v626_v13 = vadd.f32 %v625_v12, %v1780_v54  ;;  %v627_v14 = vpop.f32.mrb[43].mxu0  ;;  %1016 = vmatmul.mubr.bf16.gmra.mrb[36].mxu1 %v762_v6  ;;  %v720_v16 = vmax.f32 %v622_v9, 0.0 }
 0x155   : > { %v628_v15 = vadd.f32 %v627_v14, %v1782_v55  ;;  %v721_v18 = vmax.f32 %v624_v11, 0.0 }
 0x156   : > { %v722_v17 = vmax.f32 %v626_v13, 0.0 }
 0x157   : > { %v723_v19 = vmax.f32 %v628_v15, 0.0 }
 0x158   : > { %v764_v20 = vpack.c.bf16 %v722_v17, %v720_v16 }
 0x159   : > { %v765_v21 = vpack.c.bf16 %v723_v19, %v721_v18  ;;  %v631_v22 = vpop.f32.mrb[44].mxu0 }
 0x15a   : > { %v632_v23 = vadd.f32 %v631_v22, %v1780_v54  ;;  %v633_v24 = vpop.f32.mrb[45].mxu0 }
 0x15b   : > { %v634_v25 = vadd.f32 %v633_v24, %v1782_v55  ;;  %v635_v26 = vpop.f32.mrb[46].mxu0  ;;  %1023 = vmatprep.mubr.bf16.mxu1 %v765_v21 }
 0x15c   : > { %v636_v27 = vadd.f32 %v635_v26, %v1780_v54  ;;  %v637_v28 = vpop.f32.mrb[47].mxu0  ;;  %1024 = vmatmul.mubr.bf16.gmra.mrb[40].mxu1 %v764_v20  ;;  %v724_v30 = vmax.f32 %v632_v23, 0.0 }
 0x15d   : > { %v638_v29 = vadd.f32 %v637_v28, %v1782_v55  ;;  %v725_v32 = vmax.f32 %v634_v25, 0.0 }
 0x15e   : > { %v726_v31 = vmax.f32 %v636_v27, 0.0 }
 0x15f   : > { %v727_v33 = vmax.f32 %v638_v29, 0.0 }
 0x160   : > { %v766_v34 = vpack.c.bf16 %v726_v31, %v724_v30  ;;  %v1852_v31 = vld [vmem:[%s1989_s4] ss:$0 sm:$0xff] }
 0x161   : > { %v767_v35 = vpack.c.bf16 %v727_v33, %v725_v32  ;;  %v641_v36 = vpop.f32.mrb[48].mxu0 }
 0x162   : > { %v642_v37 = vadd.f32 %v641_v36, %v1780_v54  ;;  %v643_v38 = vpop.f32.mrb[49].mxu0 }
 0x163   : > { %v644_v39 = vadd.f32 %v643_v38, %v1782_v55  ;;  %v645_v40 = vpop.f32.mrb[50].mxu0  ;;  %1031 = vmatprep.mubr.bf16.mxu1 %v767_v35 }
 0x164   : > { %v646_v41 = vadd.f32 %v645_v40, %v1780_v54  ;;  %v647_v42 = vpop.f32.mrb[51].mxu0  ;;  %1032 = vmatmul.mubr.bf16.gmra.mrb[44].mxu1 %v766_v34  ;;  %v728_v44 = vmax.f32 %v642_v37, 0.0 }
 0x165   : > { %v648_v43 = vadd.f32 %v647_v42, %v1782_v55  ;;  %v729_v46 = vmax.f32 %v644_v39, 0.0 }
 0x166   : > { %v730_v45 = vmax.f32 %v646_v41, 0.0 }
 0x167   : > { %v731_v47 = vmax.f32 %v648_v43, 0.0 }
 0x168   : > { %v768_v48 = vpack.c.bf16 %v730_v45, %v728_v44 }
 0x169   : > { %v769_v49 = vpack.c.bf16 %v731_v47, %v729_v46  ;;  %v651_v50 = vpop.f32.mrb[52].mxu0 }
 0x16a   : > { %v652_v51 = vadd.f32 %v651_v50, %v1780_v54  ;;  %v653_v52 = vpop.f32.mrb[53].mxu0 }
 0x16b   : > { %v654_v53 = vadd.f32 %v653_v52, %v1782_v55  ;;  %v655_v56 = vpop.f32.mrb[54].mxu0  ;;  %1039 = vmatprep.mubr.bf16.mxu1 %v769_v49 }
 0x16c   : > { %v656_v57 = vadd.f32 %v655_v56, %v1780_v54  ;;  %v657_v58 = vpop.f32.mrb[55].mxu0  ;;  %1040 = vmatmul.mubr.bf16.gmra.mrb[48].mxu1 %v768_v48  ;;  %v732_v60 = vmax.f32 %v652_v51, 0.0 }
 0x16d   : > { %v658_v59 = vadd.f32 %v657_v58, %v1782_v55  ;;  %v733_v62 = vmax.f32 %v654_v53, 0.0 }
 0x16e   : > { %v734_v61 = vmax.f32 %v656_v57, 0.0 }
 0x16f   : > { %v735_v63 = vmax.f32 %v658_v59, 0.0 }
 0x170   : > { %v770_v0 = vpack.c.bf16 %v734_v61, %v732_v60 }
 0x171   : > { %v771_v1 = vpack.c.bf16 %v735_v63, %v733_v62  ;;  %v661_v2 = vpop.f32.mrb[56].mxu0 }
 0x172   : > { %v662_v3 = vadd.f32 %v661_v2, %v1780_v54  ;;  %v663_v4 = vpop.f32.mrb[57].mxu0 }
 0x173   : > { %v664_v5 = vadd.f32 %v663_v4, %v1782_v55  ;;  %v665_v6 = vpop.f32.mrb[58].mxu0  ;;  %1047 = vmatprep.mubr.bf16.mxu1 %v771_v1 }
 0x174   : > { %v666_v7 = vadd.f32 %v665_v6, %v1780_v54  ;;  %v667_v8 = vpop.f32.mrb[59].mxu0  ;;  %1048 = vmatmul.mubr.bf16.gmra.mrb[52].mxu1 %v770_v0  ;;  %v736_v10 = vmax.f32 %v662_v3, 0.0 }
 0x175   : > { %v668_v9 = vadd.f32 %v667_v8, %v1782_v55  ;;  %v737_v12 = vmax.f32 %v664_v5, 0.0 }
 0x176   : > { %v738_v11 = vmax.f32 %v666_v7, 0.0 }
 0x177   : > { %v739_v13 = vmax.f32 %v668_v9, 0.0 }
 0x178   : > { %v772_v14 = vpack.c.bf16 %v738_v11, %v736_v10 }
 0x179   : > { %v773_v15 = vpack.c.bf16 %v739_v13, %v737_v12  ;;  %v671_v16 = vpop.f32.mrb[60].mxu0 }
 0x17a   : > { %v672_v17 = vadd.f32 %v671_v16, %v1780_v54  ;;  %v673_v18 = vpop.f32.mrb[61].mxu0 }
 0x17b   : > { %v674_v19 = vadd.f32 %v673_v18, %v1782_v55  ;;  %v675_v20 = vpop.f32.mrb[62].mxu0  ;;  %1055 = vmatprep.mubr.bf16.mxu1 %v773_v15 }
 0x17c   : > { %v676_v21 = vadd.f32 %v675_v20, %v1780_v54  ;;  %v677_v22 = vpop.f32.mrb[63].mxu0  ;;  %1056 = vmatmul.mubr.bf16.gmra.mrb[56].mxu1 %v772_v14  ;;  %v740_v24 = vmax.f32 %v672_v17, 0.0 }
 0x17d   : > { %v678_v23 = vadd.f32 %v677_v22, %v1782_v55  ;;  %v741_v26 = vmax.f32 %v674_v19, 0.0 }
 0x17e   : > { %v742_v25 = vmax.f32 %v676_v21, 0.0 }
 0x17f   : > { %v743_v27 = vmax.f32 %v678_v23, 0.0 }
 0x180   : > { %v774_v28 = vpack.c.bf16 %v742_v25, %v740_v24 }
 0x181   : > { %v775_v29 = vpack.c.bf16 %v743_v27, %v741_v26 }
 0x183   : > { %1063 = vmatprep.mubr.bf16.mxu1 %v775_v29 }
 0x184   : > { %1064 = vmatmul.mubr.bf16.gmra.mrb[60].mxu1 %v774_v28 }
 0x1df   : > { %v1300_v30 = vpop.f32.mrb[0].mxu1 }
 0x1e0   : > { %v1301_v54 = vpop.f32.mrb[1].mxu1 }
 0x1e1   : > { %v1302_v32 = vadd.f32 %v1301_v54, %v1300_v30  ;;  %v1303_v55 = vpop.f32.mrb[2].mxu1 }
 0x1e2   : > { %v1304_v33 = vpop.f32.mrb[3].mxu1 }
 0x1e3   : > { %v946_v34 = vadd.f32 %v1302_v32, %v1852_v31  ;;  %v1305_v35 = vadd.f32 %v1304_v33, %v1303_v55 }
 0x1e5   : > { %v1072_v36 = vmax.f32 %v946_v34, 0.0  ;;  %v949_v37 = vadd.f32 %v1305_v35, %v1852_v31 }
 0x1e7   : > { %1104 = vst [vmem:[%s1858_s8] sm:$0xff] %v1072_v36  ;;  %v1073_v38 = vmax.f32 %v949_v37, 0.0  ;;  %v1306_v39 = vpop.f32.mrb[4].mxu1 }
 0x1e8   : > { %v1307_v40 = vpop.f32.mrb[5].mxu1 }
 0x1e9   : > { %1105 = vst [vmem:[%s1858_s8 + $0x8] sm:$0xff] %v1073_v38  ;;  %v1308_v41 = vadd.f32 %v1307_v40, %v1306_v39  ;;  %v1309_v42 = vpop.f32.mrb[6].mxu1 }
 0x1ea   : > { %v1310_v43 = vpop.f32.mrb[7].mxu1 }
 0x1eb   : > { %v954_v44 = vadd.f32 %v1308_v41, %v1852_v31  ;;  %v1311_v45 = vadd.f32 %v1310_v43, %v1309_v42 }
 0x1ed   : > { %v1074_v46 = vmax.f32 %v954_v44, 0.0  ;;  %v957_v47 = vadd.f32 %v1311_v45, %v1852_v31 }
 0x1ef   : > { %1106 = vst [vmem:[%s1858_s8 + $0x10] sm:$0xff] %v1074_v46  ;;  %v1075_v48 = vmax.f32 %v957_v47, 0.0  ;;  %v1312_v49 = vpop.f32.mrb[8].mxu1 }
 0x1f0   : > { %v1313_v50 = vpop.f32.mrb[9].mxu1 }
 0x1f1   : > { %1107 = vst [vmem:[%s1858_s8 + $0x18] sm:$0xff] %v1075_v48  ;;  %v1314_v51 = vadd.f32 %v1313_v50, %v1312_v49  ;;  %v1315_v52 = vpop.f32.mrb[10].mxu1 }
 0x1f2   : > { %v1316_v53 = vpop.f32.mrb[11].mxu1 }
 0x1f3   : > { %v962_v56 = vadd.f32 %v1314_v51, %v1852_v31  ;;  %v1317_v57 = vadd.f32 %v1316_v53, %v1315_v52 }
 0x1f5   : > { %v1076_v58 = vmax.f32 %v962_v56, 0.0  ;;  %v965_v59 = vadd.f32 %v1317_v57, %v1852_v31 }
 0x1f7   : > { %1108 = vst [vmem:[%s1858_s8 + $0x20] sm:$0xff] %v1076_v58  ;;  %v1077_v60 = vmax.f32 %v965_v59, 0.0  ;;  %v1318_v61 = vpop.f32.mrb[12].mxu1 }
 0x1f8   : > { %v1319_v62 = vpop.f32.mrb[13].mxu1 }
 0x1f9   : > { %1109 = vst [vmem:[%s1858_s8 + $0x28] sm:$0xff] %v1077_v60  ;;  %v1320_v63 = vadd.f32 %v1319_v62, %v1318_v61  ;;  %v1321_v0 = vpop.f32.mrb[14].mxu1 }
 0x1fa   : > { %v1322_v1 = vpop.f32.mrb[15].mxu1 }
 0x1fb   : > { %v970_v2 = vadd.f32 %v1320_v63, %v1852_v31  ;;  %v1323_v3 = vadd.f32 %v1322_v1, %v1321_v0 }
 0x1fd   : > { %v1078_v4 = vmax.f32 %v970_v2, 0.0  ;;  %v973_v5 = vadd.f32 %v1323_v3, %v1852_v31 }
 0x1ff   : > { %1110 = vst [vmem:[%s1858_s8 + $0x30] sm:$0xff] %v1078_v4  ;;  %v1079_v6 = vmax.f32 %v973_v5, 0.0  ;;  %v1324_v7 = vpop.f32.mrb[16].mxu1 }
 0x200   : > { %v1325_v8 = vpop.f32.mrb[17].mxu1 }
 0x201   : > { %1111 = vst [vmem:[%s1858_s8 + $0x38] sm:$0xff] %v1079_v6  ;;  %v1326_v9 = vadd.f32 %v1325_v8, %v1324_v7  ;;  %v1327_v10 = vpop.f32.mrb[18].mxu1 }
 0x202   : > { %v1328_v11 = vpop.f32.mrb[19].mxu1 }
 0x203   : > { %v978_v12 = vadd.f32 %v1326_v9, %v1852_v31  ;;  %v1329_v13 = vadd.f32 %v1328_v11, %v1327_v10 }
 0x205   : > { %v1080_v14 = vmax.f32 %v978_v12, 0.0  ;;  %v981_v15 = vadd.f32 %v1329_v13, %v1852_v31 }
 0x207   : > { %1112 = vst [vmem:[%s1858_s8 + $0x40] sm:$0xff] %v1080_v14  ;;  %v1081_v16 = vmax.f32 %v981_v15, 0.0  ;;  %v1330_v17 = vpop.f32.mrb[20].mxu1 }
 0x208   : > { %v1331_v18 = vpop.f32.mrb[21].mxu1 }
 0x209   : > { %1113 = vst [vmem:[%s1858_s8 + $0x48] sm:$0xff] %v1081_v16  ;;  %v1332_v19 = vadd.f32 %v1331_v18, %v1330_v17  ;;  %v1333_v20 = vpop.f32.mrb[22].mxu1 }
 0x20a   : > { %v1334_v21 = vpop.f32.mrb[23].mxu1 }
 0x20b   : > { %v986_v22 = vadd.f32 %v1332_v19, %v1852_v31  ;;  %v1335_v23 = vadd.f32 %v1334_v21, %v1333_v20 }
 0x20d   : > { %v1082_v24 = vmax.f32 %v986_v22, 0.0  ;;  %v989_v25 = vadd.f32 %v1335_v23, %v1852_v31 }
 0x20f   : > { %1114 = vst [vmem:[%s1858_s8 + $0x50] sm:$0xff] %v1082_v24  ;;  %v1083_v26 = vmax.f32 %v989_v25, 0.0  ;;  %v1336_v27 = vpop.f32.mrb[24].mxu1 }
 0x210   : > { %v1337_v28 = vpop.f32.mrb[25].mxu1 }
 0x211   : > { %1115 = vst [vmem:[%s1858_s8 + $0x58] sm:$0xff] %v1083_v26  ;;  %v1338_v29 = vadd.f32 %v1337_v28, %v1336_v27  ;;  %v1339_v30 = vpop.f32.mrb[26].mxu1 }
 0x212   : > { %v1340_v54 = vpop.f32.mrb[27].mxu1 }
 0x213   : > { %v994_v32 = vadd.f32 %v1338_v29, %v1852_v31  ;;  %v1341_v55 = vadd.f32 %v1340_v54, %v1339_v30 }
 0x215   : > { %v1084_v33 = vmax.f32 %v994_v32, 0.0  ;;  %v997_v34 = vadd.f32 %v1341_v55, %v1852_v31 }
 0x217   : > { %1116 = vst [vmem:[%s1858_s8 + $0x60] sm:$0xff] %v1084_v33  ;;  %v1085_v35 = vmax.f32 %v997_v34, 0.0  ;;  %v1342_v36 = vpop.f32.mrb[28].mxu1 }
 0x218   : > { %v1343_v37 = vpop.f32.mrb[29].mxu1 }
 0x219   : > { %1117 = vst [vmem:[%s1858_s8 + $0x68] sm:$0xff] %v1085_v35  ;;  %v1344_v38 = vadd.f32 %v1343_v37, %v1342_v36  ;;  %v1345_v39 = vpop.f32.mrb[30].mxu1 }
 0x21a   : > { %v1346_v40 = vpop.f32.mrb[31].mxu1 }
 0x21b   : > { %v1002_v41 = vadd.f32 %v1344_v38, %v1852_v31  ;;  %v1347_v42 = vadd.f32 %v1346_v40, %v1345_v39 }
 0x21d   : > { %v1086_v43 = vmax.f32 %v1002_v41, 0.0  ;;  %v1005_v44 = vadd.f32 %v1347_v42, %v1852_v31 }
 0x21f   : > { %1118 = vst [vmem:[%s1858_s8 + $0x70] sm:$0xff] %v1086_v43  ;;  %v1087_v45 = vmax.f32 %v1005_v44, 0.0  ;;  %v1348_v46 = vpop.f32.mrb[32].mxu1 }
 0x220   : > { %v1349_v47 = vpop.f32.mrb[33].mxu1 }
 0x221   : > { %1119 = vst [vmem:[%s1858_s8 + $0x78] sm:$0xff] %v1087_v45  ;;  %v1350_v48 = vadd.f32 %v1349_v47, %v1348_v46  ;;  %v1351_v49 = vpop.f32.mrb[34].mxu1 }
 0x222   : > { %v1352_v50 = vpop.f32.mrb[35].mxu1 }
 0x223   : > { %v1010_v51 = vadd.f32 %v1350_v48, %v1852_v31  ;;  %v1353_v52 = vadd.f32 %v1352_v50, %v1351_v49 }
 0x225   : > { %v1088_v53 = vmax.f32 %v1010_v51, 0.0  ;;  %v1013_v56 = vadd.f32 %v1353_v52, %v1852_v31 }
 0x227   : > { %1120 = vst [vmem:[%s1858_s8 + $0x80] sm:$0xff] %v1088_v53  ;;  %v1089_v57 = vmax.f32 %v1013_v56, 0.0  ;;  %v1354_v58 = vpop.f32.mrb[36].mxu1 }
 0x228   : > { %v1355_v59 = vpop.f32.mrb[37].mxu1 }
 0x229   : > { %1121 = vst [vmem:[%s1858_s8 + $0x88] sm:$0xff] %v1089_v57  ;;  %v1356_v60 = vadd.f32 %v1355_v59, %v1354_v58  ;;  %v1357_v61 = vpop.f32.mrb[38].mxu1 }
 0x22a   : > { %v1358_v62 = vpop.f32.mrb[39].mxu1 }
 0x22b   : > { %v1018_v63 = vadd.f32 %v1356_v60, %v1852_v31  ;;  %v1359_v0 = vadd.f32 %v1358_v62, %v1357_v61 }
 0x22d   : > { %v1090_v1 = vmax.f32 %v1018_v63, 0.0  ;;  %v1021_v2 = vadd.f32 %v1359_v0, %v1852_v31 }
 0x22f   : > { %1122 = vst [vmem:[%s1858_s8 + $0x90] sm:$0xff] %v1090_v1  ;;  %v1091_v3 = vmax.f32 %v1021_v2, 0.0  ;;  %v1360_v4 = vpop.f32.mrb[40].mxu1 }
 0x230   : > { %v1361_v5 = vpop.f32.mrb[41].mxu1 }
 0x231   : > { %1123 = vst [vmem:[%s1858_s8 + $0x98] sm:$0xff] %v1091_v3  ;;  %v1362_v6 = vadd.f32 %v1361_v5, %v1360_v4  ;;  %v1363_v7 = vpop.f32.mrb[42].mxu1 }
 0x232   : > { %v1364_v8 = vpop.f32.mrb[43].mxu1 }
 0x233   : > { %v1026_v9 = vadd.f32 %v1362_v6, %v1852_v31  ;;  %v1365_v10 = vadd.f32 %v1364_v8, %v1363_v7 }
 0x235   : > { %v1092_v11 = vmax.f32 %v1026_v9, 0.0  ;;  %v1029_v12 = vadd.f32 %v1365_v10, %v1852_v31 }
 0x237   : > { %1124 = vst [vmem:[%s1858_s8 + $0xa0] sm:$0xff] %v1092_v11  ;;  %v1093_v13 = vmax.f32 %v1029_v12, 0.0  ;;  %v1366_v14 = vpop.f32.mrb[44].mxu1 }
 0x238   : > { %v1367_v15 = vpop.f32.mrb[45].mxu1 }
 0x239   : > { %1125 = vst [vmem:[%s1858_s8 + $0xa8] sm:$0xff] %v1093_v13  ;;  %v1368_v16 = vadd.f32 %v1367_v15, %v1366_v14  ;;  %v1369_v17 = vpop.f32.mrb[46].mxu1 }
 0x23a   : > { %v1370_v18 = vpop.f32.mrb[47].mxu1 }
 0x23b   : > { %v1034_v19 = vadd.f32 %v1368_v16, %v1852_v31  ;;  %v1371_v20 = vadd.f32 %v1370_v18, %v1369_v17 }
 0x23d   : > { %v1094_v21 = vmax.f32 %v1034_v19, 0.0  ;;  %v1037_v22 = vadd.f32 %v1371_v20, %v1852_v31 }
 0x23f   : > { %1126 = vst [vmem:[%s1858_s8 + $0xb0] sm:$0xff] %v1094_v21  ;;  %v1095_v23 = vmax.f32 %v1037_v22, 0.0  ;;  %v1372_v24 = vpop.f32.mrb[48].mxu1 }
 0x240   : > { %v1373_v25 = vpop.f32.mrb[49].mxu1 }
 0x241   : > { %1127 = vst [vmem:[%s1858_s8 + $0xb8] sm:$0xff] %v1095_v23  ;;  %v1374_v26 = vadd.f32 %v1373_v25, %v1372_v24  ;;  %v1375_v27 = vpop.f32.mrb[50].mxu1 }
 0x242   : > { %v1376_v28 = vpop.f32.mrb[51].mxu1 }
 0x243   : > { %v1042_v29 = vadd.f32 %v1374_v26, %v1852_v31  ;;  %v1377_v30 = vadd.f32 %v1376_v28, %v1375_v27 }
 0x245   : > { %v1096_v54 = vmax.f32 %v1042_v29, 0.0  ;;  %v1045_v32 = vadd.f32 %v1377_v30, %v1852_v31 }
 0x247   : > { %1128 = vst [vmem:[%s1858_s8 + $0xc0] sm:$0xff] %v1096_v54  ;;  %v1097_v55 = vmax.f32 %v1045_v32, 0.0  ;;  %v1378_v33 = vpop.f32.mrb[52].mxu1 }
 0x248   : > { %v1379_v34 = vpop.f32.mrb[53].mxu1 }
 0x249   : > { %1129 = vst [vmem:[%s1858_s8 + $0xc8] sm:$0xff] %v1097_v55  ;;  %v1380_v35 = vadd.f32 %v1379_v34, %v1378_v33  ;;  %v1381_v36 = vpop.f32.mrb[54].mxu1 }
 0x24a   : > { %v1382_v37 = vpop.f32.mrb[55].mxu1 }
 0x24b   : > { %v1050_v38 = vadd.f32 %v1380_v35, %v1852_v31  ;;  %v1383_v39 = vadd.f32 %v1382_v37, %v1381_v36 }
 0x24d   : > { %v1098_v40 = vmax.f32 %v1050_v38, 0.0  ;;  %v1053_v41 = vadd.f32 %v1383_v39, %v1852_v31 }
 0x24f   : > { %1130 = vst [vmem:[%s1858_s8 + $0xd0] sm:$0xff] %v1098_v40  ;;  %v1099_v42 = vmax.f32 %v1053_v41, 0.0  ;;  %v1384_v43 = vpop.f32.mrb[56].mxu1 }
 0x250   : > { %v1385_v44 = vpop.f32.mrb[57].mxu1 }
 0x251   : > { %1131 = vst [vmem:[%s1858_s8 + $0xd8] sm:$0xff] %v1099_v42  ;;  %v1386_v45 = vadd.f32 %v1385_v44, %v1384_v43  ;;  %v1387_v46 = vpop.f32.mrb[58].mxu1 }
 0x252   : > { %v1388_v47 = vpop.f32.mrb[59].mxu1 }
 0x253   : > { %v1058_v48 = vadd.f32 %v1386_v45, %v1852_v31  ;;  %v1389_v49 = vadd.f32 %v1388_v47, %v1387_v46 }
 0x255   : > { %v1100_v50 = vmax.f32 %v1058_v48, 0.0  ;;  %v1061_v51 = vadd.f32 %v1389_v49, %v1852_v31 }
 0x257   : > { %1132 = vst [vmem:[%s1858_s8 + $0xe0] sm:$0xff] %v1100_v50  ;;  %v1101_v52 = vmax.f32 %v1061_v51, 0.0  ;;  %v1390_v53 = vpop.f32.mrb[60].mxu1 }
 0x258   : > { %v1391_v56 = vpop.f32.mrb[61].mxu1 }
 0x259   : > { %1133 = vst [vmem:[%s1858_s8 + $0xe8] sm:$0xff] %v1101_v52  ;;  %v1392_v57 = vadd.f32 %v1391_v56, %v1390_v53  ;;  %v1393_v58 = vpop.f32.mrb[62].mxu1 }
 0x25a   : > { %v1394_v59 = vpop.f32.mrb[63].mxu1 }
 0x25b   : > { %v1066_v60 = vadd.f32 %v1392_v57, %v1852_v31  ;;  %v1395_v61 = vadd.f32 %v1394_v59, %v1393_v58  ;;  %1143 = sbr.rel (!%p1629_p5) target bundleno = 638 (0x27e), region = 44 }
 0x25d   : > { %v1102_v62 = vmax.f32 %v1066_v60, 0.0  ;;  %v1069_v63 = vadd.f32 %v1395_v61, %v1852_v31 }
 0x25f   : > { %1134 = vst [vmem:[%s1858_s8 + $0xf0] sm:$0xff] %v1102_v62  ;;  %v1103_v0 = vmax.f32 %v1069_v63, 0.0 }
 0x261   : > { %1135 = vst [vmem:[%s1858_s8 + $0xf8] sm:$0xff] %v1103_v0 }
 0x262   : > { %s1998_s11 = smov (!%p1146_p11, %s1145_s11), 32 }
 0x263   : > { %s1929_s12 = sshll.u32 %s1998_s11, 7 }
 0x264   : > { %s1150_s13 = ssub.s32 4096, %s1929_s12 }
 0x265   : > { %1151 = vsyncadd %s1924_s10, %s1150_s13  ;;  %p1277_p12 = scmp.ne.s32.totalorder %s1929_s12, 0  ;;  %s1283_s14 = sshll.u32 %s1612_s22, 12 }
 0x266   : > { %s1938_s16 = scalar_lea.hbm %s1990_s5, %s1283_s14  ;;  %s1156_s7 = sshll.u32 %s1858_s8, 4  ;;  %s1941_s7 = int_to_ptr.vmem [resolvable:$true] %s1156_s7 }
 0x267   : > { %s1493_s17 = scalar_lea.vmem %s1941_s7, %s1929_s12  ;;  %s1558_s23 = smov [#allocation2]  }
 0x268   : > { %p1494_p13 = scmp.ne.s32.totalorder %s1941_s7, %s1493_s17  ;;  %s1497_s25 = sshll.u32 %s1558_s23, 4  ;;  %s1498_s25 = int_to_ptr.vmem [resolvable:$false] %s1497_s25 }
 0x269   : > { %s1499_s22 = scalar_lea.vmem %s1498_s25, 8192  ;;  %p1500_p2 = scmp.lt.s32.totalorder %s1941_s7, %s1498_s25 }
 0x26a   : > { %p1495_p0 = pnand %p1494_p13, %p1277_p12  ;;  %p1501_p3 = scmp.lt.s32.totalorder %s1499_s22, %s1493_s17 }
 0x26c   : > { %p1496_p1 = pneg %p1495_p0  ;;  %p1502_p4 = por %p1501_p3, %p1500_p2 }
 0x26e   : > { %p1503_p5 = pnand %p1502_p4, %p1496_p1 }
 0x270   : > { %1506 = shalt.err (!%p1503_p5)
}
 0x271   : > { %s1507_s9 = scalar_lea.hbm %s1938_s16, %s1929_s12  ;;  %s1511_s6 = scalar_lea.hbm %s1990_s5, 4864 }
 0x272   : > { %p1508_p7 = scmp.ne.s32.totalorder %s1938_s16, %s1507_s9  ;;  %p1512_p10 = scmp.lt.u32.totalorder %s1938_s16, %s1990_s5 }
 0x273   : > { %p1513_p11 = scmp.lt.u32.totalorder %s1511_s6, %s1507_s9  ;;  %p1515_p0 = scmp.lt.u32.totalorder %s1507_s9, %s1938_s16 }
 0x274   : > { %p1509_p8 = pnand %p1508_p7, %p1277_p12 }
 0x275   : > { %p1514_p13 = por %p1513_p11, %p1512_p10 }
 0x276   : > { %p1510_p9 = pneg %p1509_p8 }
 0x277   : > { %p1516_p1 = por %p1515_p0, %p1514_p13 }
 0x279   : > { %p1517_p2 = pnand %p1516_p1, %p1510_p9 }
 0x27b   : > { %1520 = shalt.err (!%p1517_p2)
}
 0x27c   : > { %s1559_s13 = smov 128   ;;  %s1560_s14 = smov 8  }
 0x27d   : > { %1162 = dma.vmem_to_hbm [thread:$0]  (%p1277_p12), %s1941_s7, %s1929_s12, %s1938_s16, %s1924_s10, %s1559_s13, %s1559_s13, %s1560_s14  }
 0x27e PF: > { %p1401_p3 = scmp.ge.s32.totalorder %s1555_s21, 2  ;;  %s1171_s15 = sand.u32 1, %s1543_s18  }
 0x27f   : > { %s1172_s28 = scalar_lea.sflag [#allocation3], %s1171_s15 }
 0x280   : > { %p1398_p4 = pnand %p1401_p3, %p1633_p6 }
 0x282   : > { %1538 = dma.done.wait (!%p1398_p4), %s1172_s28, 4096  }
 0x283   : > { %1540 = vsyncadd (!%p1398_p4), %s1172_s28, 4294963200  ;;  %p15_p5 = scmp.ge.s32.totalorder %s1616_s24, 4   ;;  %s1993_s18 = smov %s1547_s19 }
 0x284   : > { %s1994_s19 = smov %s1551_s20  ;;  %s1995_s20 = smov %s1627_s27 }
 0x285   : > { %s1996_s21 = smov %s1616_s24  ;;  %17 = sbr.rel (!%p15_p5) target bundleno = 3 (0x3), region = 75 }
 0x28c   :  { %1177 = vsyncpa [#allocation3], 1 }
 0x28d   :  { %1179 = vsyncpa [#allocation3 + $0x1], 1 }

</bundles_post_ra>
